<compile_context>
chip_gen: v7x
topology: tpu7x:2x2x1
jax: 0.10.0
libtpu: 0.0.40
codegen_flags: <defaults>
</compile_context>

<pallas_src>
import jax
import jax.numpy as jnp
from jax.experimental import pallas as pl
from jax.experimental.pallas import tpu as pltpu


def _sentiment_kernel(emb_ref, m_ref, wp_ref, bp_ref, wout_ref, bout_ref, out_ref):
    # emb_ref : (TB, S, H)  bf16  batch tile of token embeddings
    # m_ref   : (TB, S, 1)  f32   attention mask already scaled by 1/token_count
    # wp_ref  : (H, H)      bf16  pooler dense weight   (VMEM-resident)
    # bp_ref  : (1, H)      f32
    # wout_ref: (H, CP)     bf16  classifier weight, classes padded to lane width
    # bout_ref: (1, CP)     f32   padded class columns hold -1e30 (softmax ignores them)
    # out_ref : (TB, CP)    f32

    # --- synthetic BERT pooling: masked mean over S (mask carries 1/count) ---
    # f32 elementwise so the VPU path is native on v5e as well (no bf16 VALU there).
    emb = emb_ref[...].astype(jnp.float32)
    mean = jnp.sum(emb * m_ref[...], axis=1)                       # (TB, H) f32

    # --- BERT pooler: tanh(dense(mean)); bf16 MXU inputs, f32 accumulation ---
    pooled = jnp.tanh(
        jnp.dot(mean.astype(jnp.bfloat16), wp_ref[...],
                preferred_element_type=jnp.float32) + bp_ref[...]
    )                                                              # (TB, H) f32

    # --- nn.Dropout(p=0.3): identity at inference (model.eval()) ---
    # TODO(synk): training-mode dropout (Bernoulli mask via pltpu.prng_*) not applied.

    # --- nn.Linear(hidden, n_classes), class dim padded to 128 lanes ---
    logits = jnp.dot(pooled.astype(jnp.bfloat16), wout_ref[...],
                     preferred_element_type=jnp.float32) + bout_ref[...]   # (TB, CP)

    # --- nn.Softmax(dim=1), numerically stable; padded logits are -1e30 -> exp()=0 ---
    z = logits - jnp.max(logits, axis=1, keepdims=True)
    e = jnp.exp(z)
    inv_den = pl.reciprocal(jnp.sum(e, axis=1, keepdims=True), approx=True)
    out_ref[...] = e * inv_den


def _pick_tile_b(B, S, H):
    """Batch tile: multiple of 8 sublanes; 2 double-buffered bf16 emb tiles must fit
    comfortably in scoped VMEM (v7x has only 64 MiB physical / ~32 MiB scoped)."""
    budget = 24 * 1024 * 1024            # conservative headroom for v7x
    for tb in (16, 8):
        if B % tb == 0 and 2 * tb * S * H * 2 <= budget:
            return tb
    return B                              # tiny / odd batches: single block


def sentiment_classifier_head(emb, attention_mask, w_pool, b_pool, w_out, b_out):
    """emb: (B,S,H) f32, attention_mask: (B,S), w_pool: (H,H), b_pool: (1,H),
    w_out: (H,C) (= PyTorch weight.T), b_out: (1,C). Returns (B,C) probabilities."""
    B, S, H = emb.shape
    C = w_out.shape[1]
    CP = ((C + 127) // 128) * 128         # lane-dense padded class dimension

    TB = _pick_tile_b(B, S, H)
    grid = (B // TB,)

    # bf16 for the HBM-dominant embedding read + MXU weights; mask/biases stay f32.
    emb_bf = emb.astype(jnp.bfloat16)
    mask_f = attention_mask.astype(jnp.float32)
    cnt = jnp.maximum(jnp.sum(mask_f, axis=1, keepdims=True), 1.0)
    m_norm = (mask_f / cnt)[:, :, None]                            # (B, S, 1) f32

    w_pool_bf = w_pool.astype(jnp.bfloat16)
    b_pool_f = b_pool.astype(jnp.float32).reshape(1, H)
    w_out_p = jnp.zeros((H, CP), jnp.bfloat16).at[:, :C].set(w_out.astype(jnp.bfloat16))
    b_out_p = jnp.full((1, CP), -1e30, jnp.float32).at[:, :C].set(
        b_out.astype(jnp.float32).reshape(1, C))

    cost = pl.CostEstimate(
        flops=2 * B * S * H + 2 * B * H * H + 2 * B * H * CP,
        transcendentals=B * (H + CP),
        bytes_accessed=(B * S * H * 2 + B * S * 4 + H * H * 2 + H * CP * 2
                        + H * 4 + CP * 4 + B * CP * 4),
    )

    out = pl.pallas_call(
        _sentiment_kernel,
        out_shape=jax.ShapeDtypeStruct((B, CP), jnp.float32),
        grid=grid,
        in_specs=[
            pl.BlockSpec((TB, S, H), lambda i: (i, 0, 0)),   # emb: batch-tiled, pipelined
            pl.BlockSpec((TB, S, 1), lambda i: (i, 0, 0)),   # normalized mask
            pl.BlockSpec((H, H),  lambda i: (0, 0)),         # weights: VMEM-resident
            pl.BlockSpec((1, H),  lambda i: (0, 0)),
            pl.BlockSpec((H, CP), lambda i: (0, 0)),
            pl.BlockSpec((1, CP), lambda i: (0, 0)),
        ],
        out_specs=pl.BlockSpec((TB, CP), lambda i: (i, 0)),
        compiler_params=pltpu.CompilerParams(
            # batch grid steps are independent -> shard across v7x's 2 TensorCores
            dimension_semantics=("parallel",),
            # For realistic BERT S*H raise scoped VMEM (e.g. vmem_limit_bytes=48<<20
            # on v5e/v6e); keep live buffers <= ~24 MiB on v7x's 64 MiB VMEM.
        ),
        cost_estimate=cost,
    )(emb_bf, m_norm, w_pool_bf, b_pool_f, w_out_p, b_out_p)

    return out[:, :C]


if __name__ == "__main__":
    # Small shapes implied by the forward pass (batch large enough to exercise tiling).
    B, S, H, C, VOCAB = 32, 8, 32, 3, 50

    key = jax.random.PRNGKey(0)
    k_emb, k_wp, k_bp, k_wo, k_bo, k_ids, k_msk = jax.random.split(key, 7)

    # Deterministic synthetic parameters.
    embedding_table = jax.random.normal(k_emb, (VOCAB, H), dtype=jnp.float32) * 0.02
    w_pool = jax.random.normal(k_wp, (H, H), dtype=jnp.float32) * 0.05      # pooler dense
    b_pool = jax.random.normal(k_bp, (1, H), dtype=jnp.float32) * 0.01
    w_out_pt = jax.random.normal(k_wo, (C, H), dtype=jnp.float32) * 0.05    # nn.Linear weight (C,H)
    b_out = jax.random.normal(k_bo, (1, C), dtype=jnp.float32) * 0.01

    # Deterministic example inputs.
    input_ids = jax.random.randint(k_ids, (B, S), 0, VOCAB, dtype=jnp.int32)
    lens = jax.random.randint(k_msk, (B, 1), 1, S + 1, dtype=jnp.int32)
    attention_mask = (jnp.arange(S)[None, :] < lens).astype(jnp.int32)

    # Embedding gather kept in plain JAX glue.
    # TODO(synk): fuse the gather into the kernel (table in HBM via memory_space=pl.ANY
    # + scalar-prefetched input_ids) to avoid round-tripping (B,S,H) through HBM.
    emb = embedding_table[input_ids]                       # (B, S, H) f32

    probs = sentiment_classifier_head(
        emb, attention_mask, w_pool, b_pool, w_out_pt.T, b_out
    )
    probs = jax.block_until_ready(probs)

    # Pure-JAX f32 reference of the same forward pass.
    mask_f = attention_mask.astype(jnp.float32)
    cnt = jnp.maximum(mask_f.sum(axis=1, keepdims=True), 1.0)
    mean = (emb * mask_f[:, :, None]).sum(axis=1) / cnt
    pooled = jnp.tanh(mean @ w_pool + b_pool)
    ref = jax.nn.softmax(pooled @ w_out_pt.T + b_out, axis=1)

    assert probs.shape == (B, C)
    # loose tolerances: bf16 matmul inputs + approx (EUP) reciprocal in the softmax
    assert bool(jnp.allclose(jnp.sum(probs, axis=1), 1.0, atol=1e-2))
    assert bool(jnp.allclose(probs, ref, atol=1e-2))
    print("KERNEL_OK")
</pallas_src>

<mosaic_0001>
module attributes {stable_mosaic.version = 11 : i64} {
  func.func @_sentiment_kernel(%arg0: i32, %arg1: memref<16x8x32xbf16, #tpu.memory_space<vmem>>, %arg2: memref<16x8x1xf32, #tpu.memory_space<vmem>>, %arg3: memref<32x32xbf16, #tpu.memory_space<vmem>>, %arg4: memref<1x32xf32, #tpu.memory_space<vmem>>, %arg5: memref<32x128xbf16, #tpu.memory_space<vmem>>, %arg6: memref<1x128xf32, #tpu.memory_space<vmem>>, %arg7: memref<16x128xf32, #tpu.memory_space<vmem>>) attributes {dimension_semantics = [#tpu.dimension_semantics<parallel>], iteration_bounds = array<i64: 2>, scalar_prefetch = 0 : i64, scratch_operands = 0 : i64, tpu.core_type = #tpu.core_type<tc>, window_params = [{transform_indices = @transform_0, window_bounds = array<i64: 16, 8, 32>}, {transform_indices = @transform_1, window_bounds = array<i64: 16, 8, 1>}, {pipeline_mode = #tpu.pipeline_mode<synchronous>, transform_indices = @transform_2, window_bounds = array<i64: 32, 32>}, {pipeline_mode = #tpu.pipeline_mode<synchronous>, transform_indices = @transform_3, window_bounds = array<i64: 1, 32>}, {pipeline_mode = #tpu.pipeline_mode<synchronous>, transform_indices = @transform_4, window_bounds = array<i64: 32, 128>}, {pipeline_mode = #tpu.pipeline_mode<synchronous>, transform_indices = @transform_5, window_bounds = array<i64: 1, 128>}, {transform_indices = @transform_6, window_bounds = array<i64: 16, 128>}]} {
    %c0 = arith.constant 0 : index
    %c0_0 = arith.constant 0 : index
    %c0_1 = arith.constant 0 : index
    %0 = vector.load %arg1[%c0, %c0_0, %c0_1] : memref<16x8x32xbf16, #tpu.memory_space<vmem>>, vector<16x8x32xbf16>
    %1 = arith.extf %0 : vector<16x8x32xbf16> to vector<16x8x32xf32>
    %c0_2 = arith.constant 0 : index
    %c0_3 = arith.constant 0 : index
    %c0_4 = arith.constant 0 : index
    %2 = vector.load %arg2[%c0_2, %c0_3, %c0_4] : memref<16x8x1xf32, #tpu.memory_space<vmem>>, vector<16x8x1xf32>
    %3 = vector.broadcast %2 : vector<16x8x1xf32> to vector<16x8x32xf32>
    %4 = arith.mulf %1, %3 : vector<16x8x32xf32>
    %cst = arith.constant dense<0.000000e+00> : vector<16x32xf32>
    %5 = vector.multi_reduction <add>, %4, %cst [1] : vector<16x8x32xf32> to vector<16x32xf32>
    %6 = arith.truncf %5 : vector<16x32xf32> to vector<16x32xbf16>
    %c0_5 = arith.constant 0 : index
    %c0_6 = arith.constant 0 : index
    %7 = vector.load %arg3[%c0_5, %c0_6] : memref<32x32xbf16, #tpu.memory_space<vmem>>, vector<32x32xbf16>
    %cst_7 = arith.constant dense<0.000000e+00> : vector<16x32xf32>
    %8 = tpu.matmul %6, %7, %cst_7 {dimension_numbers = #tpu.dot_dimension_numbers<[1], [0], [0], [1], [0, 0, 1, 1], [], []>} : vector<16x32xbf16>, vector<32x32xbf16>, vector<16x32xf32> -> vector<16x32xf32>
    %c0_8 = arith.constant 0 : index
    %c0_9 = arith.constant 0 : index
    %9 = vector.load %arg4[%c0_8, %c0_9] : memref<1x32xf32, #tpu.memory_space<vmem>>, vector<1x32xf32>
    %10 = vector.broadcast %9 : vector<1x32xf32> to vector<16x32xf32>
    %11 = arith.addf %8, %10 : vector<16x32xf32>
    %12 = math.tanh %11 : vector<16x32xf32>
    %13 = arith.truncf %12 : vector<16x32xf32> to vector<16x32xbf16>
    %c0_10 = arith.constant 0 : index
    %c0_11 = arith.constant 0 : index
    %14 = vector.load %arg5[%c0_10, %c0_11] : memref<32x128xbf16, #tpu.memory_space<vmem>>, vector<32x128xbf16>
    %cst_12 = arith.constant dense<0.000000e+00> : vector<16x128xf32>
    %15 = tpu.matmul %13, %14, %cst_12 {dimension_numbers = #tpu.dot_dimension_numbers<[1], [0], [0], [1], [0, 0, 1, 1], [], []>} : vector<16x32xbf16>, vector<32x128xbf16>, vector<16x128xf32> -> vector<16x128xf32>
    %c0_13 = arith.constant 0 : index
    %c0_14 = arith.constant 0 : index
    %16 = vector.load %arg6[%c0_13, %c0_14] : memref<1x128xf32, #tpu.memory_space<vmem>>, vector<1x128xf32>
    %17 = vector.broadcast %16 : vector<1x128xf32> to vector<16x128xf32>
    %18 = arith.addf %15, %17 : vector<16x128xf32>
    %cst_15 = arith.constant dense<0xFF800000> : vector<16xf32>
    %19 = vector.multi_reduction <maximumf>, %18, %cst_15 [1] : vector<16x128xf32> to vector<16xf32>
    %20 = vector.shape_cast %19 : vector<16xf32> to vector<16x1xf32>
    %21 = vector.broadcast %20 : vector<16x1xf32> to vector<16x128xf32>
    %22 = arith.subf %18, %21 : vector<16x128xf32>
    %23 = math.exp %22 : vector<16x128xf32>
    %cst_16 = arith.constant dense<0.000000e+00> : vector<16xf32>
    %24 = vector.multi_reduction <add>, %23, %cst_16 [1] : vector<16x128xf32> to vector<16xf32>
    %25 = vector.shape_cast %24 : vector<16xf32> to vector<16x1xf32>
    %26 = tpu.reciprocal %25 {approx = true} : vector<16x1xf32> -> vector<16x1xf32>
    %27 = vector.broadcast %26 : vector<16x1xf32> to vector<16x128xf32>
    %28 = arith.mulf %23, %27 : vector<16x128xf32>
    %c0_17 = arith.constant 0 : index
    %c0_18 = arith.constant 0 : index
    %29 = vector.load %arg7[%c0_17, %c0_18] : memref<16x128xf32, #tpu.memory_space<vmem>>, vector<16x128xf32>
    tpu.vector_store %arg7[%c0_17, %c0_18], %28 {strides = array<i32>} : memref<16x128xf32, #tpu.memory_space<vmem>>, vector<16x128xf32>,
    return
  }
  func.func @transform_0(%arg0: i32) -> (i32, i32, i32) {
    %c0_i32 = arith.constant 0 : i32
    %c0_i32_0 = arith.constant 0 : i32
    %c0_i32_1 = arith.constant 0 : i32
    return %arg0, %c0_i32, %c0_i32_0 : i32, i32, i32
  }
  func.func @transform_1(%arg0: i32) -> (i32, i32, i32) {
    %c0_i32 = arith.constant 0 : i32
    %c0_i32_0 = arith.constant 0 : i32
    %c0_i32_1 = arith.constant 0 : i32
    return %arg0, %c0_i32, %c0_i32_0 : i32, i32, i32
  }
  func.func @transform_2(%arg0: i32) -> (i32, i32) {
    %c0_i32 = arith.constant 0 : i32
    %c0_i32_0 = arith.constant 0 : i32
    %c0_i32_1 = arith.constant 0 : i32
    return %c0_i32, %c0_i32_0 : i32, i32
  }
  func.func @transform_3(%arg0: i32) -> (i32, i32) {
    %c0_i32 = arith.constant 0 : i32
    %c0_i32_0 = arith.constant 0 : i32
    %c0_i32_1 = arith.constant 0 : i32
    return %c0_i32, %c0_i32_0 : i32, i32
  }
  func.func @transform_4(%arg0: i32) -> (i32, i32) {
    %c0_i32 = arith.constant 0 : i32
    %c0_i32_0 = arith.constant 0 : i32
    %c0_i32_1 = arith.constant 0 : i32
    return %c0_i32, %c0_i32_0 : i32, i32
  }
  func.func @transform_5(%arg0: i32) -> (i32, i32) {
    %c0_i32 = arith.constant 0 : i32
    %c0_i32_0 = arith.constant 0 : i32
    %c0_i32_1 = arith.constant 0 : i32
    return %c0_i32, %c0_i32_0 : i32, i32
  }
  func.func @transform_6(%arg0: i32) -> (i32, i32) {
    %c0_i32 = arith.constant 0 : i32
    %c0_i32_0 = arith.constant 0 : i32
    return %arg0, %c0_i32 : i32, i32
  }
}

</mosaic_0001>

<bundles_post_ra>
// kernel: tpu_custom_call.1
= control target key start
LH: loop header
LB: loop body
LE: loop exit
PB: predicated region body
PF: predicated region fallthrough
CT: control target
= control target key end

     0   :  { %11 = vsyncpa [#allocation3], 0  ;;  %s1292_s0 = inlined_call_operand.vmem [shape: bf16[32,8,32], index: 0, kind: input, shape index: {}]   ;;  %s1293_s1 = inlined_call_operand.vmem [shape: f32[32,8,1], index: 1, kind: input, shape index: {}]   ;;  %s1294_s2 = inlined_call_operand.vmem [shape: bf16[32,32], index: 2, kind: input, shape index: {}]   ;;  %s1295_s3 = inlined_call_operand.vmem [shape: f32[1,32], index: 3, kind: input, shape index: {}]   ;;  %s1296_s4 = inlined_call_operand.vmem [shape: bf16[32,128], index: 4, kind: input, shape index: {}]   ;;  %s1297_s5 = inlined_call_operand.vmem [shape: f32[1,128], index: 5, kind: input, shape index: {}]   ;;  %s1298_s6 = inlined_call_operand.hbm [shape: f32[32,128], index: 6, kind: output, shape index: {}]  }
   0x1   :  { %13 = vsyncpa [#allocation3 + $0x1], 0  ;;  %s1099_s21 = smov 0   ;;  %s1101_s22 = smov 0  }
   0x2   :  { %s1103_s23 = smov 0   ;;  %s1105_s24 = smov 0  }
   0x3 LB: > { %s1120_s25 = sadd.s32 4294967295, %s1056_s24   ;;  %s848_s26 = sadd.s32 4294967294, %s1056_s24   ;;  %s1056_s24 = sphi %s1105_s24, %s1304_s24   ;;  %s1052_s23 = sphi %s1103_s23, %s1303_s23   ;;  %s1048_s22 = sphi %s1101_s22, %s1302_s22   ;;  %s1044_s21 = sphi %s1099_s21, %s1301_s21  }
   0x4   : > { %s1124_s27 = sadd.s32 1, %s1056_s24   ;;  %s162_s28 = sadd.s32 1, %s1052_s23 }
   0x5   : > { %s159_s29 = ssub.s32 %s1056_s24, %s1124_s27  ;;  %p172_p0 = scmp.ne.s32.totalorder %s1052_s23, %s1048_s22 }
   0x6   : > { %p160_p1 = scmp.eq.s32.totalorder %s159_s29, 0  ;;  %p173_p2 = scmp.eq.s32.totalorder %s1120_s25, 1 }
   0x7   : > { %p178_p3 = scmp.ne.s32.totalorder %s1048_s22, %s1044_s21  ;;  %p179_p4 = scmp.eq.s32.totalorder %s848_s26, 1 }
   0x8   : > { %s1135_s30 = scalar_select %p160_p1, %s1052_s23, %s162_s28  }
   0x9   : > { %p1137_p5 = por %p173_p2, %p172_p0  ;;  %p1141_p6 = por %p179_p4, %p178_p3 }
   0xa   : > { %p851_p7 = scmp.ge.s32.totalorder %s1056_s24, 1  ;;  %p227_p8 = scmp.lt.s32.totalorder %s1056_s24, 3 }
   0xc   : > { %p228_p9 = pnand %p851_p7, %p227_p8 }
   0xd   : > { %s853_s9 = sshll.u32 (!%p228_p9), %s1120_s25, 4  ;;  %v1058_v0 = vmov (!%p228_p9), 0   ;;  %v978_v17 = vld [vmem:[%s1294_s2] sm:$0xff] (!%p228_p9)   ;;  %v1059_v18 = vmov (!%p228_p9), 0.0   ;;  %v979_v19 = vld [vmem:[%s1294_s2 + $0x8] sm:$0xff] (!%p228_p9)   ;;  %vm1060_vm0 = vmmov (!%p228_p9), 0  }
   0xe   : > { %231 = sbr.rel (%p228_p9) target bundleno = 980 (0x3d4), region = 44  ;;  %977 = vset.pattern.permute.xlu1 (!%p228_p9), %v1058_v0  ;;  %976 = vset.pattern.permute.xlu0 (!%p228_p9), %v1058_v0  ;;  %p263_p10 = scmp.lt.s32.totalorder (!%p228_p9), %s853_s9, 31  ;;  %vm420_vm1 = vcmask (!%p228_p9), 261120   ;;  %vm592_vm2 = vcmask (!%p228_p9), 1041409   ;;  %vm594_vm3 = vcmask (!%p228_p9), 1042434   ;;  %vm596_vm4 = vcmask (!%p228_p9), 1043459  }
   0xf   : > { %916 = vmatprep.subr.bf16.mxu0 (!%p228_p9), %v1059_v18  ;;  %924 = vmatprep.subr.bf16.mxu1 (!%p228_p9), %v1059_v18  ;;  %vm598_vm5 = vcmask (!%p228_p9), 1044484   ;;  %vm600_vm6 = vcmask (!%p228_p9), 1045509   ;;  %vm602_vm7 = vcmask (!%p228_p9), 1046534   ;;  %vm604_vm8 = vcmask (!%p228_p9), 1047559   ;;  %s259_s15 = sand.u32 (!%p228_p9), 1, %s1048_s22   ;;  %s870_s17 = sshll.u32 (!%p228_p9), %s1120_s25, 8 }
  0x10   : > { %917 = vmatpush3.bf16.msra.mxu0 (!%p228_p9), %v978_v17  ;;  %920 = vmatprep.mubr.msk.bf16.mxu0 (!%p228_p9), %vm1060_vm0, %v1059_v18  ;;  %s852_s16 = sshll.u32 (!%p228_p9), %s259_s15, 4  ;;  %s1247_s28 = scalar_lea.hbm (!%p228_p9), %s1298_s6, %s870_s17 }
  0x11   : > { %918 = vmatprep.subr.bf16.mxu0 (!%p228_p9), %v1059_v18  ;;  %928 = vmatprep.mubr.msk.bf16.mxu1 (!%p228_p9), %vm1060_vm0, %v1059_v18  ;;  %s1251_s29 = scalar_lea.sflag (!%p228_p9), [#allocation3], %s259_s15  ;;  %s1061_s25 = smov (!%p228_p9), [#allocation2]  }
  0x14   : > { %919 = vmatpush3.bf16.msra.mxu0 (!%p228_p9), %v979_v19 }
  0x15   : > { %s1306_s9 = smov (!%p263_p10, %s853_s9), 31 }
  0x16   : > { %s856_s10 = sshll.u32 %s1306_s9, 3  ;;  %s854_s18 = sshll.u32 %s1306_s9, 2 }
  0x17   : > { %s272_s13 = scalar_lea.vmem %s1293_s1, %s856_s10  ;;  %s1169_s26 = scalar_lea.vmem %s1292_s0, %s854_s18 }
  0x18   : > { %v316_v1 = vld [vmem:[%s272_s13 + $0x40] sm:$0xff]  ;;  %v317_v3 = vld [vmem:[%s272_s13 + $0x48] sm:$0xff]  ;;  %v318_v5 = vld [vmem:[%s272_s13 + $0x50] sm:$0xff]  ;;  %s261_s18 = scalar_lea.vmem [#allocation2], %s852_s16  ;;  %s998_s10 = sshll.u32 %s1061_s25, 4  ;;  %s999_s10 = int_to_ptr.vmem [resolvable:$false] %s998_s10 }
  0x19   : > { %v308_v2 = vld [vmem:[%s272_s13] sm:$0xff]  ;;  %366 = vperm.xlu1 %977, %v316_v1   ;;  %v309_v4 = vld [vmem:[%s272_s13 + $0x8] sm:$0xff]  ;;  %v310_v6 = vld [vmem:[%s272_s13 + $0x10] sm:$0xff]  ;;  %s774_s19 = sshll.u32 %s261_s18, 4  ;;  %s1000_s11 = scalar_lea.vmem %s999_s10, 512  ;;  %s1249_s19 = int_to_ptr.vmem [resolvable:$true] %s774_s19 }
  0x1a   : > { %326 = vperm.xlu0 %976, %v308_v2   ;;  %v319_v7 = vld [vmem:[%s272_s13 + $0x58] sm:$0xff]  ;;  %v320_v9 = vld [vmem:[%s272_s13 + $0x60] sm:$0xff]  ;;  %v321_v11 = vld [vmem:[%s272_s13 + $0x68] sm:$0xff]  ;;  %s994_s9 = scalar_lea.vmem %s1249_s19, 256  ;;  %p1001_p0 = scmp.lt.s32.totalorder %s1249_s19, %s999_s10 }
  0x1b   : > { %v311_v8 = vld [vmem:[%s272_s13 + $0x18] sm:$0xff]  ;;  %v312_v10 = vld [vmem:[%s272_s13 + $0x20] sm:$0xff]  ;;  %v313_v12 = vld [vmem:[%s272_s13 + $0x28] sm:$0xff]  ;;  %p995_p11 = scmp.ne.s32.totalorder %s1249_s19, %s994_s9  ;;  %p1002_p1 = scmp.lt.s32.totalorder %s1000_s11, %s994_s9 }
  0x1c   : > { %v322_v13 = vld [vmem:[%s272_s13 + $0x70] sm:$0xff]  ;;  %v323_v15 = vld [vmem:[%s272_s13 + $0x78] sm:$0xff]  ;;  %v906_v20 = vld [vmem:[%s1169_s26 + $0x20] sm:$0xff]  }
  0x1d   : > { %371 = vperm.xlu1 %977, %v317_v3   ;;  %v314_v14 = vld [vmem:[%s272_s13 + $0x30] sm:$0xff]  ;;  %v315_v16 = vld [vmem:[%s272_s13 + $0x38] sm:$0xff]  ;;  %v872_v21 = vld [vmem:[%s1169_s26] sm:$0xff]   ;;  %v889_v22 = vunpack.c.l.bf16 %v906_v20  ;;  %v890_v28 = vunpack.c.h.bf16 %v906_v20  ;;  %p996_p12 = pnand %p995_p11, %p1137_p5  ;;  %p1003_p2 = por %p1002_p1, %p1001_p0 }
  0x1e   : > { %331 = vperm.xlu0 %976, %v309_v4   ;;  %v873_v23 = vunpack.c.l.bf16 %v872_v21  ;;  %v874_v29 = vunpack.c.h.bf16 %v872_v21  ;;  %v907_v30 = vld [vmem:[%s1169_s26 + $0x28] sm:$0xff]  }
  0x1f   : > { %v903_v31 = vld [vmem:[%s1169_s26 + $0x8] sm:$0xff]   ;;  %v893_v40 = vunpack.c.l.bf16 %v907_v30  ;;  %v894_v54 = vunpack.c.h.bf16 %v907_v30  ;;  %p997_p13 = pneg %p996_p12 }
  0x20   : > { %v877_v41 = vunpack.c.l.bf16 %v903_v31  ;;  %v878_v55 = vunpack.c.h.bf16 %v903_v31  ;;  %v1186_v31 = vld [vmem:[%s1169_s26 + $0x38] sm:$0xff]  }
  0x21   : > { %376 = vperm.xlu1 %977, %v318_v5   ;;  %p1004_p3 = pnand %p1003_p2, %p997_p13 }
  0x22   : > { %336 = vperm.xlu0 %976, %v310_v6   ;;  %v908_v6 = vld [vmem:[%s1169_s26 + $0x30] sm:$0xff]  }
  0x25   : > { %381 = vperm.xlu1 %977, %v319_v7   ;;  %v904_v7 = vld [vmem:[%s1169_s26 + $0x10] sm:$0xff]  }
  0x26   : > { %341 = vperm.xlu0 %976, %v311_v8   ;;  %v881_v17 = vunpack.c.l.bf16 %v904_v7 }
  0x29   : > { %386 = vperm.xlu1 %977, %v320_v9  }
  0x2a   : > { %346 = vperm.xlu0 %976, %v312_v10  }
  0x2d   : > { %391 = vperm.xlu1 %977, %v321_v11  }
  0x2e   : > { %351 = vperm.xlu0 %976, %v313_v12  }
  0x31   : > { %396 = vperm.xlu1 %977, %v322_v13  }
  0x32   : > { %356 = vperm.xlu0 %976, %v314_v14  }
  0x35   : > { %401 = vperm.xlu1 %977, %v323_v15   ;;  %v897_v15 = vunpack.c.l.bf16 %v908_v6 }
  0x36   : > { %361 = vperm.xlu0 %976, %v315_v16  }
  0x98   : > { %v367_v24 = vpop.permute.xlu1 %366 }
  0x99   : > { %v327_v25 = vpop.permute.xlu0 %326  ;;  %v412_v26 = vmul.f32 %v889_v22, %v367_v24 }
  0x9a   : > { %v404_v27 = vmul.f32 %v873_v23, %v327_v25 }
  0x9b   : > { %v477_v32 = vsel %vm420_vm1, %v412_v26, 0.0 }
  0x9c   : > { %v421_v33 = vsel %vm420_vm1, %v404_v27, 0.0  ;;  %v478_v34 = vrot.slane %v477_v32, 4  ;;  %v372_v36 = vpop.permute.xlu1 %371 }
  0x9d   : > { %v422_v35 = vrot.slane %v421_v33, 4  ;;  %v332_v37 = vpop.permute.xlu0 %331  ;;  %v413_v38 = vmul.f32 %v890_v28, %v372_v36 }
  0x9e   : > { %v405_v39 = vmul.f32 %v874_v29, %v332_v37  ;;  %v479_v42 = vadd.f32 %v478_v34, %v477_v32  ;;  %v1189_v32 = vld [vmem:[%s1169_s26 + $0x18] sm:$0xff]  }
  0x9f   : > { %v423_v43 = vadd.f32 %v422_v35, %v421_v33  ;;  %v484_v44 = vsel %vm420_vm1, %v413_v38, 0.0 }
  0xa0   : > { %v428_v45 = vsel %vm420_vm1, %v405_v39, 0.0  ;;  %v480_v46 = vrot.slane %v479_v42, 2  ;;  %v485_v48 = vrot.slane %v484_v44, 4  ;;  %v377_v50 = vpop.permute.xlu1 %376  ;;  %v898_v39 = vunpack.c.h.bf16 %v908_v6 }
  0xa1   : > { %v424_v47 = vrot.slane %v423_v43, 2  ;;  %v429_v49 = vrot.slane %v428_v45, 4  ;;  %v337_v51 = vpop.permute.xlu0 %336  ;;  %v414_v52 = vmul.f32 %v893_v40, %v377_v50  ;;  %v882_v40 = vunpack.c.h.bf16 %v904_v7 }
  0xa2   : > { %v406_v53 = vmul.f32 %v877_v41, %v337_v51  ;;  %v486_v56 = vadd.f32 %v485_v48, %v484_v44  ;;  %v481_v60 = vadd.f32 %v480_v46, %v479_v42  ;;  %v885_v44 = vunpack.c.l.bf16 %v1189_v32 }
  0xa3   : > { %v430_v57 = vadd.f32 %v429_v49, %v428_v45  ;;  %v491_v58 = vsel %vm420_vm1, %v414_v52, 0.0  ;;  %v425_v61 = vadd.f32 %v424_v47, %v423_v43  ;;  %v901_v43 = vunpack.c.l.bf16 %v1186_v31 }
  0xa4   : > { %v435_v59 = vsel %vm420_vm1, %v406_v53, 0.0  ;;  %v487_v62 = vrot.slane %v486_v56, 2  ;;  %v382_v0 = vpop.permute.xlu1 %381  ;;  %v492_v2 = vrot.slane %v491_v58, 4  ;;  %v482_v12 = vrot.slane %v481_v60, 1 }
  0xa5   : > { %v431_v63 = vrot.slane %v430_v57, 2  ;;  %v342_v1 = vpop.permute.xlu0 %341  ;;  %v436_v3 = vrot.slane %v435_v59, 4  ;;  %v415_v4 = vmul.f32 %v894_v54, %v382_v0  ;;  %v426_v13 = vrot.slane %v425_v61, 1 }
  0xa6   : > { %v407_v5 = vmul.f32 %v878_v55, %v342_v1  ;;  %v488_v8 = vadd.f32 %v487_v62, %v486_v56  ;;  %v493_v19 = vadd.f32 %v492_v2, %v491_v58  ;;  %v483_v25 = vadd.f32 %v482_v12, %v481_v60 }
  0xa7   : > { %v432_v9 = vadd.f32 %v431_v63, %v430_v57  ;;  %v498_v10 = vsel %vm420_vm1, %v415_v4, 0.0  ;;  %v437_v20 = vadd.f32 %v436_v3, %v435_v59  ;;  %v427_v26 = vadd.f32 %v426_v13, %v425_v61 }
  0xa8   : > { %v442_v11 = vsel %vm420_vm1, %v407_v5, 0.0  ;;  %v387_v14 = vpop.permute.xlu1 %386  ;;  %v499_v21 = vrot.slane %v498_v10, 4  ;;  %v489_v23 = vrot.slane %v488_v8, 1  ;;  %v494_v33 = vrot.slane %v493_v19, 2 }
  0xa9   : > { %v347_v16 = vpop.permute.xlu0 %346  ;;  %v443_v22 = vrot.slane %v442_v11, 4  ;;  %v433_v24 = vrot.slane %v432_v9, 1  ;;  %v416_v27 = vmul.f32 %v897_v15, %v387_v14  ;;  %v438_v34 = vrot.slane %v437_v20, 2 }
  0xaa   : > { %v408_v28 = vmul.f32 %v881_v17, %v347_v16  ;;  %v500_v35 = vadd.f32 %v499_v21, %v498_v10  ;;  %v490_v41 = vadd.f32 %v489_v23, %v488_v8  ;;  %v541_v45 = vpack.c.bf16 %v483_v25, %v483_v25 }
  0xab   : > { %v444_v36 = vadd.f32 %v443_v22, %v442_v11  ;;  %v505_v37 = vsel %vm420_vm1, %v416_v27, 0.0  ;;  %v434_v42 = vadd.f32 %v433_v24, %v432_v9  ;;  %v533_v46 = vpack.c.bf16 %v427_v26, %v427_v26 }
  0xac   : > { %v392_v29 = vpop.permute.xlu1 %391  ;;  %v449_v38 = vsel %vm420_vm1, %v408_v28, 0.0  ;;  %v506_v47 = vrot.slane %v505_v37, 4  ;;  %v495_v49 = vadd.f32 %v494_v33, %v493_v19  ;;  %v439_v50 = vadd.f32 %v438_v34, %v437_v20 }
  0xad   : > { %v352_v30 = vpop.permute.xlu0 %351  ;;  %v450_v48 = vrot.slane %v449_v38, 4  ;;  %v501_v51 = vrot.slane %v500_v35, 2  ;;  %v445_v52 = vrot.slane %v444_v36, 2  ;;  %v417_v55 = vmul.f32 %v898_v39, %v392_v29 }
  0xae   : > { %v507_v53 = vadd.f32 %v506_v47, %v505_v37  ;;  %v409_v56 = vmul.f32 %v882_v40, %v352_v30  ;;  %v542_v59 = vpack.c.bf16 %v490_v41, %v490_v41  ;;  %v534_v60 = vpack.c.bf16 %v434_v42, %v434_v42 }
  0xaf   : > { %v451_v54 = vadd.f32 %v450_v48, %v449_v38  ;;  %v902_v61 = vunpack.c.h.bf16 %v1186_v31  ;;  %v886_v62 = vunpack.c.h.bf16 %v1189_v32  ;;  %v512_v1 = vsel %vm420_vm1, %v417_v55, 0.0 }
  0xb0   : > { %v397_v57 = vpop.permute.xlu1 %396  ;;  %v508_v63 = vrot.slane %v507_v53, 2  ;;  %v456_v2 = vsel %vm420_vm1, %v409_v56, 0.0  ;;  %v1199_v3 = vunpack.c.l.b16 %v541_v45  ;;  %v1201_v4 = vunpack.c.l.b16 %v533_v46 }
  0xb1   : > { %v357_v58 = vpop.permute.xlu0 %356  ;;  %v452_v0 = vrot.slane %v451_v54, 2  ;;  %v496_v5 = vrot.slane %v495_v49, 1  ;;  %v440_v6 = vrot.slane %v439_v50, 1  ;;  %v502_v7 = vadd.f32 %v501_v51, %v500_v35 }
  0xb2   : > { %v446_v8 = vadd.f32 %v445_v52, %v444_v36  ;;  %v513_v9 = vrot.slane %v512_v1, 4  ;;  %v457_v10 = vrot.slane %v456_v2, 4  ;;  %v1203_v11 = vunpack.c.l.b16 %v542_v59 }
  0xb3   : > { %v1205_v12 = vunpack.c.l.b16 %v534_v60  ;;  %v418_v13 = vmul.f32 %v901_v43, %v397_v57  ;;  %v410_v14 = vmul.f32 %v885_v44, %v357_v58  ;;  %v509_v15 = vadd.f32 %v508_v63, %v507_v53 }
  0xb4   : > { %v453_v16 = vadd.f32 %v452_v0, %v451_v54  ;;  %v514_v17 = vadd.f32 %v513_v9, %v512_v1  ;;  %v458_v19 = vadd.f32 %v457_v10, %v456_v2  ;;  %v402_v20 = vpop.permute.xlu1 %401  ;;  %v497_v22 = vadd.f32 %v496_v5, %v495_v49 }
  0xb5   : > { %v362_v21 = vpop.permute.xlu0 %361  ;;  %v441_v23 = vadd.f32 %v440_v6, %v439_v50  ;;  %v519_v24 = vsel %vm420_vm1, %v418_v13, 0.0  ;;  %v463_v25 = vsel %vm420_vm1, %v410_v14, 0.0  ;;  %v503_v26 = vrot.slane %v502_v7, 1 }
  0xb6   : > { %v447_v27 = vrot.slane %v446_v8, 1  ;;  %v515_v28 = vrot.slane %v514_v17, 2  ;;  %v459_v29 = vrot.slane %v458_v19, 2  ;;  %v520_v30 = vrot.slane %v519_v24, 4 }
  0xb7   : > { %v464_v31 = vrot.slane %v463_v25, 4  ;;  %v419_v32 = vmul.f32 %v902_v61, %v402_v20  ;;  %v411_v33 = vmul.f32 %v886_v62, %v362_v21  ;;  %v510_v34 = vrot.slane %v509_v15, 1 }
  0xb8   : > { %v454_v35 = vrot.slane %v453_v16, 1  ;;  %v516_v36 = vadd.f32 %v515_v28, %v514_v17  ;;  %v460_v37 = vadd.f32 %v459_v29, %v458_v19  ;;  %v521_v38 = vadd.f32 %v520_v30, %v519_v24 }
  0xb9   : > { %v465_v39 = vadd.f32 %v464_v31, %v463_v25  ;;  %v526_v40 = vsel %vm420_vm1, %v419_v32, 0.0  ;;  %v470_v41 = vsel %vm420_vm1, %v411_v33, 0.0  ;;  %v504_v42 = vadd.f32 %v503_v26, %v502_v7 }
  0xba   : > { %v448_v43 = vadd.f32 %v447_v27, %v446_v8  ;;  %v517_v44 = vrot.slane %v516_v36, 1  ;;  %v461_v45 = vrot.slane %v460_v37, 1  ;;  %v522_v46 = vrot.slane %v521_v38, 2 }
  0xbb   : > { %v466_v47 = vrot.slane %v465_v39, 2  ;;  %v527_v48 = vrot.slane %v526_v40, 4  ;;  %v471_v49 = vrot.slane %v470_v41, 4  ;;  %v511_v50 = vadd.f32 %v510_v34, %v509_v15 }
  0xbc   : > { %v455_v51 = vadd.f32 %v454_v35, %v453_v16  ;;  %v518_v52 = vadd.f32 %v517_v44, %v516_v36  ;;  %v462_v53 = vadd.f32 %v461_v45, %v460_v37  ;;  %v523_v54 = vadd.f32 %v522_v46, %v521_v38  ;;  %v980_v46 = vld [vmem:[%s1296_s4] sm:$0xff]  }
  0xbd   : > { %v467_v55 = vadd.f32 %v466_v47, %v465_v39  ;;  %v528_v56 = vadd.f32 %v527_v48, %v526_v40  ;;  %v472_v57 = vadd.f32 %v471_v49, %v470_v41  ;;  %v543_v58 = vpack.c.bf16 %v497_v22, %v497_v22  ;;  %925 = vmatpush3.bf16.msra.mxu1 %v980_v46  ;;  %v981_v47 = vld [vmem:[%s1296_s4 + $0x8] sm:$0xff]   ;;  %v857_v48 = vld [vmem:[%s1295_s3] ss:$0 sm:$0xff] }
  0xbe   : > { %v535_v59 = vpack.c.bf16 %v441_v23, %v441_v23  ;;  %v544_v60 = vpack.c.bf16 %v504_v42, %v504_v42  ;;  %v536_v61 = vpack.c.bf16 %v448_v43, %v448_v43  ;;  %v524_v62 = vrot.slane %v523_v54, 1  ;;  %926 = vmatprep.subr.bf16.mxu1 %v1059_v18  ;;  %v861_v18 = vld [vmem:[%s1297_s5] ss:$0 sm:$0xff] }
  0xbf   : > { %v468_v63 = vrot.slane %v467_v55, 1  ;;  %v529_v0 = vrot.slane %v528_v56, 2  ;;  %v473_v1 = vrot.slane %v472_v57, 2  ;;  %v545_v2 = vpack.c.bf16 %v511_v50, %v511_v50 }
  0xc0   : > { %v537_v5 = vpack.c.bf16 %v455_v51, %v455_v51  ;;  %v546_v6 = vpack.c.bf16 %v518_v52, %v518_v52  ;;  %v538_v7 = vpack.c.bf16 %v462_v53, %v462_v53  ;;  %v525_v8 = vadd.f32 %v524_v62, %v523_v54 }
  0xc1   : > { %v469_v9 = vadd.f32 %v468_v63, %v467_v55  ;;  %v530_v10 = vadd.f32 %v529_v0, %v528_v56  ;;  %v474_v13 = vadd.f32 %v473_v1, %v472_v57  ;;  %v586_v14 = vunpack.c.l.b16 %v543_v58  ;;  %927 = vmatpush3.bf16.msra.mxu1 %v981_v47 }
  0xc2   : > { %v578_v15 = vunpack.c.l.b16 %v535_v59  ;;  %v587_v16 = vunpack.c.l.b16 %v544_v60  ;;  %v579_v17 = vunpack.c.l.b16 %v536_v61  ;;  %v547_v19 = vpack.c.bf16 %v525_v8, %v525_v8 }
  0xc3   : > { %v539_v20 = vpack.c.bf16 %v469_v9, %v469_v9  ;;  %v531_v21 = vrot.slane %v530_v10, 1  ;;  %v475_v22 = vrot.slane %v474_v13, 1  ;;  %v606_v23 = vsel %vm592_vm2, %v1203_v11, %v1199_v3 }
  0xc4   : > { %v593_v24 = vsel %vm592_vm2, %v1205_v12, %v1201_v4  ;;  %v588_v25 = vunpack.c.l.b16 %v545_v2  ;;  %v580_v26 = vunpack.c.l.b16 %v537_v5  ;;  %v589_v27 = vunpack.c.l.b16 %v546_v6 }
  0xc5   : > { %v581_v28 = vunpack.c.l.b16 %v538_v7  ;;  %v532_v29 = vadd.f32 %v531_v21, %v530_v10  ;;  %v476_v30 = vadd.f32 %v475_v22, %v474_v13  ;;  %v607_v31 = vsel %vm594_vm3, %v586_v14, %v606_v23 }
  0xc6   : > { %v595_v32 = vsel %vm594_vm3, %v578_v15, %v593_v24  ;;  %v590_v33 = vunpack.c.l.b16 %v547_v19  ;;  %v582_v34 = vunpack.c.l.b16 %v539_v20  ;;  %v608_v35 = vsel %vm596_vm4, %v587_v16, %v607_v31 }
  0xc7   : > { %v597_v3 = vsel %vm596_vm4, %v579_v17, %v595_v32  ;;  %v548_v11 = vpack.c.bf16 %v532_v29, %v532_v29  ;;  %v540_v36 = vpack.c.bf16 %v476_v30, %v476_v30  ;;  %v609_v4 = vsel %vm598_vm5, %v588_v25, %v608_v35 }
  0xc8   : > { %v599_v12 = vsel %vm598_vm5, %v580_v26, %v597_v3  ;;  %v610_v40 = vsel %vm600_vm6, %v589_v27, %v609_v4 }
  0xc9   : > { %v591_v37 = vunpack.c.l.b16 %v548_v11  ;;  %v583_v38 = vunpack.c.l.b16 %v540_v36  ;;  %v601_v39 = vsel %vm600_vm6, %v581_v28, %v599_v12  ;;  %v611_v42 = vsel %vm602_vm7, %v590_v33, %v610_v40 }
  0xca   : > { %v603_v41 = vsel %vm602_vm7, %v582_v34, %v601_v39 }
  0xcb   : > { %v605_v43 = vsel %vm604_vm8, %v583_v38, %v603_v41  ;;  %v612_v44 = vsel %vm604_vm8, %v591_v37, %v611_v42 }
  0xcc   : > { %v613_v45 = vpack.c.b16 %v612_v44, %v605_v43 }
  0xce   : > { %921 = vmatmul.mubr.msk.bf16.vlgmr.msra.gmra.mrb[0].mxu0 %vm420_vm1, %v613_v45 }
 0x1a1   : > { %v663_v49 = vpop.f32.mrb[0].mxu0 }
 0x1a2   : > { %v664_v50 = vadd.f32 %v857_v48, %v663_v49  ;;  %v922_v51 = vpop.f32.mrb[1].mxu0 }
 0x1a3   : > { %v666_v52 = vpop.f32.mrb[2].mxu0 }
 0x1a4   : > { %v667_v53 = vadd.f32 %v857_v48, %v666_v52  ;;  %v923_v54 = vpop.f32.mrb[3].mxu0  ;;  %982 = vtanh.f32 %v664_v50 }
 0x1a6   : > { %984 = vtanh.f32 %v667_v53 }
 0x1ae   : > { %v983_v55 = vpop.eup %982 }
 0x1b0   : > { %v985_v56 = vpop.eup %984 }
 0x1b1   : > { %v672_v57 = vpack.c.bf16 %v985_v56, %v983_v55 }
 0x1b3   : > { %929 = vmatmul.mubr.msk.bf16.vlgmr.msra.gmra.mrb[0].mxu1 %vm420_vm1, %v672_v57 }
 0x286   : > { %v733_v58 = vpop.f32.mrb[0].mxu1 }
 0x287   : > { %v734_v59 = vadd.f32 %v861_v18, %v733_v58  ;;  %v930_v60 = vpop.f32.mrb[1].mxu1 }
 0x288   : > { %v736_v61 = vpop.f32.mrb[2].mxu1 }
 0x289   : > { %v737_v62 = vadd.f32 %v861_v18, %v736_v61  ;;  %740 = vmax.xlane.f32.xlu0 %v734_v59  ;;  %v931_v63 = vpop.f32.mrb[3].mxu1 }
 0x28b   : > { %742 = vmax.xlane.f32.xlu1 %v737_v62 }
 0x316   : > { %v741_v0 = vpop.xlane.xlu0 %740 }
 0x317   : > { %v744_v1 = vsub.f32 %v734_v59, %v741_v0 }
 0x318   : > { %v743_v2 = vpop.xlane.xlu1 %742 }
 0x319   : > { %v746_v5 = vmul.f32 1.442695, %v744_v1  ;;  %v745_v6 = vsub.f32 %v737_v62, %v743_v2 }
 0x31b   : > { %986 = vpow2.f32 %v746_v5  ;;  %v748_v7 = vmul.f32 1.442695, %v745_v6 }
 0x31d   : > { %988 = vpow2.f32 %v748_v7 }
 0x325   : > { %v987_v8 = vpop.eup %986 }
 0x326   : > { %750 = vadd.xlane.f32.xlu0 %v987_v8 }
 0x327   : > { %v989_v9 = vpop.eup %988 }
 0x32a   : > { %752 = vadd.xlane.f32.xlu0 %v989_v9 }
 0x3b3   : > { %v751_v10 = vpop.xlane.xlu0 %750 }
 0x3b4   : > { %990 = vrcp.f32 %v751_v10 }
 0x3b7   : > { %v753_v13 = vpop.xlane.xlu0 %752 }
 0x3b8   : > { %992 = vrcp.f32 %v753_v13 }
 0x3be   : > { %v991_v14 = vpop.eup %990 }
 0x3bf   : > { %v756_v15 = vmul.f32 %v991_v14, %v987_v8 }
 0x3c1   : > { %758 = vst [vmem:[%s261_s18] sm:$0xff] %v756_v15 }
 0x3c2   : > { %v993_v16 = vpop.eup %992 }
 0x3c3   : > { %v757_v17 = vmul.f32 %v993_v16, %v989_v9 }
 0x3c5   : > { %759 = vst [vmem:[%s261_s18 + $0x8] sm:$0xff] %v757_v17 }
 0x3c6   : > { %1007 = shalt.err (!%p1004_p3)
}
 0x3c7   : > { %s1008_s12 = scalar_lea.hbm %s1247_s28, 256  ;;  %s1012_s15 = scalar_lea.hbm %s1298_s6, 512 }
 0x3c8   : > { %p1009_p4 = scmp.ne.s32.totalorder %s1247_s28, %s1008_s12  ;;  %p1013_p9 = scmp.lt.u32.totalorder %s1247_s28, %s1298_s6 }
 0x3c9   : > { %p1014_p10 = scmp.lt.u32.totalorder %s1012_s15, %s1008_s12  ;;  %p1016_p12 = scmp.lt.u32.totalorder %s1008_s12, %s1247_s28 }
 0x3ca   : > { %p1010_p7 = pnand %p1009_p4, %p1137_p5 }
 0x3cb   : > { %p1015_p11 = por %p1014_p10, %p1013_p9 }
 0x3cc   : > { %p1011_p8 = pneg %p1010_p7 }
 0x3cd   : > { %p1017_p13 = por %p1016_p12, %p1015_p11 }
 0x3cf   : > { %p1018_p0 = pnand %p1017_p13, %p1011_p8 }
 0x3d1   : > { %1021 = shalt.err (!%p1018_p0)
}
 0x3d2   : > { %s1062_s18 = smov 128   ;;  %s1063_s20 = smov 8  }
 0x3d3   : > { %932 = dma.vmem_to_hbm [thread:$0]  (%p1137_p5), %s1249_s19, 256, %s1247_s28, %s1251_s29, %s1062_s18, %s1062_s18, %s1063_s20  }
 0x3d4 PF: > { %p938_p1 = scmp.ge.s32.totalorder %s1056_s24, 2  ;;  %s789_s26 = sand.u32 1, %s1044_s21  }
 0x3d5   : > { %s790_s9 = scalar_lea.sflag [#allocation3], %s789_s26 }
 0x3d6   : > { %p935_p2 = pnand %p938_p1, %p1141_p6 }
 0x3d8   : > { %1039 = dma.done.wait (!%p935_p2), %s790_s9, 256  }
 0x3d9   : > { %1041 = vsyncadd (!%p935_p2), %s790_s9, 4294967040  ;;  %p16_p3 = scmp.ge.s32.totalorder %s1124_s27, 4   ;;  %s1301_s21 = smov %s1048_s22 }
 0x3da   : > { %s1302_s22 = smov %s1052_s23  ;;  %s1303_s23 = smov %s1135_s30 }
 0x3db   : > { %s1304_s24 = smov %s1124_s27  ;;  %18 = sbr.rel (!%p16_p3) target bundleno = 3 (0x3), region = 82 }
 0x3e2   :  { %795 = vsyncpa [#allocation3], 1 }
 0x3e3   :  { %797 = vsyncpa [#allocation3 + $0x1], 1 }

</bundles_post_ra>
